<compile_context>
chip_gen: v5e
topology: v5e:2x2
jax: 0.10.0
libtpu: 0.0.40
codegen_flags: <defaults>
</compile_context>

<pallas_src>
import math

import jax
import jax.numpy as jnp
import numpy as np
from jax.experimental import pallas as pl
from jax.experimental.pallas import tpu as pltpu

LANE = 128      # lane width: last dim of every tile padded to this
SUBLANE = 16    # sublane alignment (covers bf16 packing; multiple of f32's 8)


def _round_up(x, m):
    return ((x + m - 1) // m) * m


def _pad2d(x, rows, cols):
    pr, pc = rows - x.shape[0], cols - x.shape[1]
    if pr or pc:
        x = jnp.pad(x, ((0, pr), (0, pc)))
    return x


def agg_kernel(vl_ref, gl_ref, w1v_ref, w1g_ref, b1_ref, w2_ref, b2_ref, o_ref):
    # fc_1 over the virtual concat (exact fold), bf16 MXU feeds, f32 accumulation.
    h = (jnp.dot(vl_ref[...], w1v_ref[...], preferred_element_type=jnp.float32)
         + jnp.dot(gl_ref[...], w1g_ref[...], preferred_element_type=jnp.float32))
    h = jnp.maximum(h + b1_ref[...], 0.0)        # bias + relu in f32 (VPU)
    h = h.astype(w2_ref.dtype)                   # bf16 feed for the 2nd MXU pass
    o_ref[...] = (jnp.dot(h, w2_ref[...], preferred_element_type=jnp.float32)
                  + b2_ref[...]).astype(o_ref.dtype)


def agg_forward(vl_emb, gl_emb, params, *, block_b=None, compute_dtype=jnp.bfloat16):
    bs, E = vl_emb.shape
    assert gl_emb.shape == (bs, E)
    out_dtype = vl_emb.dtype                     # output tracks input dtype

    # Pad E to the lane width so output stores are unmasked and MXU K/N are filled.
    E_pad = _round_up(max(E, LANE), LANE)

    # Batch-tile selection: sublane-aligned; large tiles for large batches (amortize
    # ~0.35us/step), >=2 tiles when possible so v7x's two TensorCores both get work.
    bs_aligned = _round_up(bs, SUBLANE)
    if block_b is None:
        if bs_aligned >= 2048:
            block_b = 512
        elif bs_aligned >= 2 * SUBLANE:
            block_b = _round_up(pl.cdiv(bs_aligned, 2), SUBLANE)
        else:
            block_b = bs_aligned
    else:
        block_b = _round_up(block_b, SUBLANE)
    grid_b = pl.cdiv(bs_aligned, block_b)
    bs_pad = grid_b * block_b                    # no ragged last tile

    # Weight prep: split W1 to fold the concat; cast MXU feeds to bf16; zero-pad to
    # (E_pad, E_pad) (exact: padded rows/cols contribute zero). Biases stay f32.
    w1 = params["W1"]                            # (2E, E), stored (in, out)
    w1v = _pad2d(w1[:E].astype(compute_dtype), E_pad, E_pad)
    w1g = _pad2d(w1[E:].astype(compute_dtype), E_pad, E_pad)
    w2 = _pad2d(params["W2"].astype(compute_dtype), E_pad, E_pad)
    b1 = _pad2d(params["b1"].reshape(1, E).astype(jnp.float32), 1, E_pad)
    b2 = _pad2d(params["b2"].reshape(1, E).astype(jnp.float32), 1, E_pad)

    vl = _pad2d(vl_emb.astype(compute_dtype), bs_pad, E_pad)
    gl = _pad2d(gl_emb.astype(compute_dtype), bs_pad, E_pad)

    act_spec = pl.BlockSpec((block_b, E_pad), lambda i: (i, 0))
    w_spec = pl.BlockSpec((E_pad, E_pad), lambda i: (0, 0))   # constant -> VMEM-resident
    b_spec = pl.BlockSpec((1, E_pad), lambda i: (0, 0))
    out_spec = pl.BlockSpec((block_b, E_pad), lambda i: (i, 0))  # final layout, lane-dense

    # VMEM budget: resident weights (double-buffer headroom) + streamed act/out tiles.
    abytes = jnp.dtype(compute_dtype).itemsize
    obytes = jnp.dtype(out_dtype).itemsize
    vmem_need = (2 * 3 * E_pad * E_pad * abytes          # weights (x2 headroom)
                 + 2 * 2 * E_pad * 4                     # biases
                 + 2 * 2 * block_b * E_pad * abytes      # double-buffered vl, gl
                 + 2 * block_b * E_pad * obytes)         # double-buffered out
    vmem_limit = max(32 * 1024 * 1024, min(int(vmem_need * 1.25), 64 * 1024 * 1024))
    # TODO(synk): if resident weights alone exceed ~64 MiB (v7x), add a second grid axis
    # tiling the output columns of W1/W2 instead of keeping them fully resident.

    flops = 6 * bs_pad * E_pad * E_pad           # 2*bs*(2E*E) + 2*bs*(E*E)
    bytes_accessed = (2 * bs_pad * E_pad * abytes        # vl, gl
                      + 3 * E_pad * E_pad * abytes       # weights
                      + 2 * E_pad * 4                    # biases
                      + bs_pad * E_pad * obytes)         # output
    cost = pl.CostEstimate(flops=flops, transcendentals=0, bytes_accessed=bytes_accessed)

    out = pl.pallas_call(
        agg_kernel,
        out_shape=jax.ShapeDtypeStruct((bs_pad, E_pad), out_dtype),
        grid_spec=pltpu.PrefetchScalarGridSpec(
            num_scalar_prefetch=0,
            grid=(grid_b,),
            in_specs=[
                act_spec,           # vl_emb
                act_spec,           # gl_emb
                w_spec, w_spec,     # W1[:E], W1[E:]
                b_spec,             # b1
                w_spec,             # W2
                b_spec,             # b2
            ],
            out_specs=out_spec,
        ),
        compiler_params=pltpu.CompilerParams(
            dimension_semantics=("parallel",),
            vmem_limit_bytes=vmem_limit),
        cost_estimate=cost,
    )(vl, gl, w1v, w1g, b1, w2, b2)

    return out[:bs, :E]


def agg_reference(vl_emb, gl_emb, params):
    """Plain-JAX (f32) reference matching the PyTorch forward."""
    v = jnp.concatenate([vl_emb, gl_emb], axis=1)
    h = jnp.maximum(v @ params["W1"] + params["b1"], 0.0)
    return h @ params["W2"] + params["b2"]


def init_params(key, E):
    # Deterministic synthetic weights in (in_features, out_features) layout
    # (already transposed relative to torch's (out, in) storage).
    ks = jax.random.split(key, 4)
    s1 = 1.0 / math.sqrt(2 * E)
    s2 = 1.0 / math.sqrt(E)
    return {
        "W1": jax.random.uniform(ks[0], (2 * E, E), jnp.float32, -s1, s1),
        "b1": jax.random.uniform(ks[1], (E,), jnp.float32, -s1, s1),
        "W2": jax.random.uniform(ks[2], (E, E), jnp.float32, -s2, s2),
        "b2": jax.random.uniform(ks[3], (E,), jnp.float32, -s2, s2),
    }


if __name__ == "__main__":
    bs, E = 2, 32

    key = jax.random.PRNGKey(0)
    k_v, k_g, k_p = jax.random.split(key, 3)
    vl_emb = jax.random.normal(k_v, (bs, E), dtype=jnp.float32)
    gl_emb = jax.random.normal(k_g, (bs, E), dtype=jnp.float32)
    params = init_params(k_p, E)

    out = agg_forward(vl_emb, gl_emb, params)
    out = jax.block_until_ready(out)

    ref = agg_reference(vl_emb, gl_emb, params)
    assert out.shape == (bs, E)
    assert out.dtype == vl_emb.dtype
    # bf16 MXU feeds with f32 accumulation -> loose-ish tolerance vs the f32 reference.
    np.testing.assert_allclose(np.asarray(out), np.asarray(ref), rtol=2e-2, atol=2e-2)

    print("KERNEL_OK")
</pallas_src>

<mosaic_0001>
module attributes {stable_mosaic.version = 11 : i64} {
  func.func @agg_kernel(%arg0: i32, %arg1: memref<16x128xbf16, #tpu.memory_space<vmem>>, %arg2: memref<16x128xbf16, #tpu.memory_space<vmem>>, %arg3: memref<128x128xbf16, #tpu.memory_space<vmem>>, %arg4: memref<128x128xbf16, #tpu.memory_space<vmem>>, %arg5: memref<1x128xf32, #tpu.memory_space<vmem>>, %arg6: memref<128x128xbf16, #tpu.memory_space<vmem>>, %arg7: memref<1x128xf32, #tpu.memory_space<vmem>>, %arg8: memref<16x128xf32, #tpu.memory_space<vmem>>) attributes {dimension_semantics = [#tpu.dimension_semantics<parallel>], iteration_bounds = array<i64: 1>, scalar_prefetch = 0 : i64, scratch_operands = 0 : i64, tpu.core_type = #tpu.core_type<tc>, window_params = [{transform_indices = @transform_0, window_bounds = array<i64: 16, 128>}, {transform_indices = @transform_1, window_bounds = array<i64: 16, 128>}, {pipeline_mode = #tpu.pipeline_mode<synchronous>, transform_indices = @transform_2, window_bounds = array<i64: 128, 128>}, {pipeline_mode = #tpu.pipeline_mode<synchronous>, transform_indices = @transform_3, window_bounds = array<i64: 128, 128>}, {pipeline_mode = #tpu.pipeline_mode<synchronous>, transform_indices = @transform_4, window_bounds = array<i64: 1, 128>}, {pipeline_mode = #tpu.pipeline_mode<synchronous>, transform_indices = @transform_5, window_bounds = array<i64: 128, 128>}, {pipeline_mode = #tpu.pipeline_mode<synchronous>, transform_indices = @transform_6, window_bounds = array<i64: 1, 128>}, {transform_indices = @transform_7, window_bounds = array<i64: 16, 128>}]} {
    %c0 = arith.constant 0 : index
    %c0_0 = arith.constant 0 : index
    %0 = vector.load %arg1[%c0, %c0_0] : memref<16x128xbf16, #tpu.memory_space<vmem>>, vector<16x128xbf16>
    %c0_1 = arith.constant 0 : index
    %c0_2 = arith.constant 0 : index
    %1 = vector.load %arg3[%c0_1, %c0_2] : memref<128x128xbf16, #tpu.memory_space<vmem>>, vector<128x128xbf16>
    %cst = arith.constant dense<0.000000e+00> : vector<16x128xf32>
    %2 = tpu.matmul %0, %1, %cst {dimension_numbers = #tpu.dot_dimension_numbers<[1], [0], [0], [1], [0, 0, 1, 1], [], []>} : vector<16x128xbf16>, vector<128x128xbf16>, vector<16x128xf32> -> vector<16x128xf32>
    %c0_3 = arith.constant 0 : index
    %c0_4 = arith.constant 0 : index
    %3 = vector.load %arg2[%c0_3, %c0_4] : memref<16x128xbf16, #tpu.memory_space<vmem>>, vector<16x128xbf16>
    %c0_5 = arith.constant 0 : index
    %c0_6 = arith.constant 0 : index
    %4 = vector.load %arg4[%c0_5, %c0_6] : memref<128x128xbf16, #tpu.memory_space<vmem>>, vector<128x128xbf16>
    %cst_7 = arith.constant dense<0.000000e+00> : vector<16x128xf32>
    %5 = tpu.matmul %3, %4, %cst_7 {dimension_numbers = #tpu.dot_dimension_numbers<[1], [0], [0], [1], [0, 0, 1, 1], [], []>} : vector<16x128xbf16>, vector<128x128xbf16>, vector<16x128xf32> -> vector<16x128xf32>
    %6 = arith.addf %2, %5 : vector<16x128xf32>
    %c0_8 = arith.constant 0 : index
    %c0_9 = arith.constant 0 : index
    %7 = vector.load %arg5[%c0_8, %c0_9] : memref<1x128xf32, #tpu.memory_space<vmem>>, vector<1x128xf32>
    %8 = vector.broadcast %7 : vector<1x128xf32> to vector<16x128xf32>
    %9 = arith.addf %6, %8 : vector<16x128xf32>
    %cst_10 = arith.constant 0.000000e+00 : f32
    %10 = vector.broadcast %cst_10 : f32 to vector<16x128xf32>
    %11 = arith.maximumf %9, %10 : vector<16x128xf32>
    %12 = arith.truncf %11 : vector<16x128xf32> to vector<16x128xbf16>
    %c0_11 = arith.constant 0 : index
    %c0_12 = arith.constant 0 : index
    %13 = vector.load %arg6[%c0_11, %c0_12] : memref<128x128xbf16, #tpu.memory_space<vmem>>, vector<128x128xbf16>
    %cst_13 = arith.constant dense<0.000000e+00> : vector<16x128xf32>
    %14 = tpu.matmul %12, %13, %cst_13 {dimension_numbers = #tpu.dot_dimension_numbers<[1], [0], [0], [1], [0, 0, 1, 1], [], []>} : vector<16x128xbf16>, vector<128x128xbf16>, vector<16x128xf32> -> vector<16x128xf32>
    %c0_14 = arith.constant 0 : index
    %c0_15 = arith.constant 0 : index
    %15 = vector.load %arg7[%c0_14, %c0_15] : memref<1x128xf32, #tpu.memory_space<vmem>>, vector<1x128xf32>
    %16 = vector.broadcast %15 : vector<1x128xf32> to vector<16x128xf32>
    %17 = arith.addf %14, %16 : vector<16x128xf32>
    %c0_16 = arith.constant 0 : index
    %c0_17 = arith.constant 0 : index
    %18 = vector.load %arg8[%c0_16, %c0_17] : memref<16x128xf32, #tpu.memory_space<vmem>>, vector<16x128xf32>
    tpu.vector_store %arg8[%c0_16, %c0_17], %17 {strides = array<i32>} : memref<16x128xf32, #tpu.memory_space<vmem>>, vector<16x128xf32>,
    return
  }
  func.func @transform_0(%arg0: i32) -> (i32, i32) {
    %c0_i32 = arith.constant 0 : i32
    %c0_i32_0 = arith.constant 0 : i32
    return %arg0, %c0_i32 : i32, i32
  }
  func.func @transform_1(%arg0: i32) -> (i32, i32) {
    %c0_i32 = arith.constant 0 : i32
    %c0_i32_0 = arith.constant 0 : i32
    return %arg0, %c0_i32 : i32, i32
  }
  func.func @transform_2(%arg0: i32) -> (i32, i32) {
    %c0_i32 = arith.constant 0 : i32
    %c0_i32_0 = arith.constant 0 : i32
    %c0_i32_1 = arith.constant 0 : i32
    return %c0_i32, %c0_i32_0 : i32, i32
  }
  func.func @transform_3(%arg0: i32) -> (i32, i32) {
    %c0_i32 = arith.constant 0 : i32
    %c0_i32_0 = arith.constant 0 : i32
    %c0_i32_1 = arith.constant 0 : i32
    return %c0_i32, %c0_i32_0 : i32, i32
  }
  func.func @transform_4(%arg0: i32) -> (i32, i32) {
    %c0_i32 = arith.constant 0 : i32
    %c0_i32_0 = arith.constant 0 : i32
    %c0_i32_1 = arith.constant 0 : i32
    return %c0_i32, %c0_i32_0 : i32, i32
  }
  func.func @transform_5(%arg0: i32) -> (i32, i32) {
    %c0_i32 = arith.constant 0 : i32
    %c0_i32_0 = arith.constant 0 : i32
    %c0_i32_1 = arith.constant 0 : i32
    return %c0_i32, %c0_i32_0 : i32, i32
  }
  func.func @transform_6(%arg0: i32) -> (i32, i32) {
    %c0_i32 = arith.constant 0 : i32
    %c0_i32_0 = arith.constant 0 : i32
    %c0_i32_1 = arith.constant 0 : i32
    return %c0_i32, %c0_i32_0 : i32, i32
  }
  func.func @transform_7(%arg0: i32) -> (i32, i32) {
    %c0_i32 = arith.constant 0 : i32
    %c0_i32_0 = arith.constant 0 : i32
    return %arg0, %c0_i32 : i32, i32
  }
}

</mosaic_0001>

<bundles_post_ra>
// kernel: tpu_custom_call.1
= control target key start
LH: loop header
LB: loop body
LE: loop exit
PB: predicated region body
PF: predicated region fallthrough
CT: control target
= control target key end

     0   :  { %12 = vsyncpa [#allocation3], 0  ;;  %s759_s0 = inlined_call_operand.hbm [shape: bf16[16,128], index: 0, kind: input, shape index: {}]   ;;  %s760_s1 = inlined_call_operand.hbm [shape: bf16[16,128], index: 1, kind: input, shape index: {}]   ;;  %s761_s2 = inlined_call_operand.hbm [shape: bf16[128,128], index: 2, kind: input, shape index: {}]   ;;  %s762_s3 = inlined_call_operand.hbm [shape: bf16[128,128], index: 3, kind: input, shape index: {}]   ;;  %s763_s4 = inlined_call_operand.vmem [shape: f32[1,128], index: 4, kind: input, shape index: {}]   ;;  %s764_s5 = inlined_call_operand.hbm [shape: bf16[128,128], index: 5, kind: input, shape index: {}]   ;;  %s765_s6 = inlined_call_operand.vmem [shape: f32[1,128], index: 6, kind: input, shape index: {}]   ;;  %s766_s7 = inlined_call_operand.hbm [shape: f32[16,128], index: 7, kind: output, shape index: {}]  }
   0x1   :  { %13 = vsyncpa [#allocation6], 0 }
   0x2   :  { %14 = vsyncpa [#allocation9], 0 }
   0x3   :  { %15 = vsyncpa [#allocation4], 0  ;;  %s33_s26 = sshll.u32 %s760_s1, 4  ;;  %s685_s27 = smov [#allocation5]   ;;  %s34_s26 = int_to_ptr.hbm [resolvable:$true] %s33_s26 }
   0x4   :  { %s35_s28 = sshll.u32 %s685_s27, 4  ;;  %s59_s8 = sshll.u32 %s762_s3, 4  ;;  %s36_s28 = int_to_ptr.vmem [resolvable:$true] %s35_s28  ;;  %s60_s8 = int_to_ptr.hbm [resolvable:$true] %s59_s8 }
   0x5   :  { %s686_s9 = smov 64   ;;  %s687_s10 = smov 4  }
   0x6   :  { %41 = dma.hbm_to_vmem [thread:$0]  %s34_s26, 128, %s36_s28, [#allocation6], %s686_s9, %s686_s9, %s687_s10  }
   0x7   :  { %s688_s11 = smov [#allocation8]   ;;  %s20_s15 = sshll.u32 %s759_s0, 4  ;;  %s21_s15 = int_to_ptr.hbm [resolvable:$true] %s20_s15 }
   0x8   :  { %s61_s12 = sshll.u32 %s688_s11, 4  ;;  %s46_s17 = sshll.u32 %s761_s2, 4  ;;  %s62_s12 = int_to_ptr.vmem [resolvable:$true] %s61_s12  ;;  %s47_s17 = int_to_ptr.hbm [resolvable:$true] %s46_s17 }
   0x9   :  { %67 = dma.hbm_to_vmem [thread:$0]  %s60_s8, 1024, %s62_s12, [#allocation9], %s686_s9, %s686_s9, %s687_s10  }
   0xa   :  { %s689_s18 = smov [#allocation2]   ;;  %s690_s3 = smov [#allocation7]  }
   0xb   :  { %s22_s19 = sshll.u32 %s689_s18, 4  ;;  %s48_s20 = sshll.u32 %s690_s3, 4  ;;  %s23_s19 = int_to_ptr.vmem [resolvable:$true] %s22_s19  ;;  %s49_s20 = int_to_ptr.vmem [resolvable:$true] %s48_s20 }
   0xc   :  { %28 = dma.hbm_to_vmem [thread:$0]  %s21_s15, 128, %s23_s19, [#allocation3], %s686_s9, %s686_s9, %s687_s10  }
   0xd   :  { %s74_s23 = sshll.u32 %s764_s5, 4  ;;  %s691_s0 = smov [#allocation10]   ;;  %s75_s23 = int_to_ptr.hbm [resolvable:$true] %s74_s23 }
   0xe   :  { %54 = dma.hbm_to_vmem [thread:$0]  %s47_s17, 1024, %s49_s20, [#allocation6], %s686_s9, %s686_s9, %s687_s10  }
   0xf   :  { %s76_s24 = sshll.u32 %s691_s0, 4  ;;  %s77_s24 = int_to_ptr.vmem [resolvable:$true] %s76_s24 }
  0x10   :  { %82 = dma.hbm_to_vmem [thread:$0]  %s75_s23, 1024, %s77_s24, [#allocation9], %s686_s9, %s686_s9, %s687_s10  }
  0x11   :  { %677 = dma.done.wait [#allocation3], 128  }
  0x12   :  { %678 = vsyncadd [#allocation3], 4294967168 }
  0x13   :  { %679 = dma.done.wait [#allocation6], 1152  }
  0x14   :  { %680 = vsyncadd [#allocation6], 4294966144 }
  0x15   :  { %681 = dma.done.wait [#allocation9], 2048  }
  0x16   :  { %682 = vsyncadd [#allocation9], 4294965248  ;;  %v512_v0 = vld [vmem:[#allocation8 + $0x38] sm:$0xff]  ;;  %v511_v2 = vld [vmem:[#allocation8 + $0x30] sm:$0xff]  ;;  %s692_s27 = smov [#allocation11]   ;;  %s376_s30 = sshll.u32 %s766_s7, 4  ;;  %s377_s30 = int_to_ptr.hbm [resolvable:$true] %s376_s30 }
  0x17   :  { %v503_v1 = vld [vmem:[#allocation7 + $0x38] sm:$0xff]  ;;  %195 = vmatpush.bf16.msra.mxu0 %v512_v0  ;;  %v502_v3 = vld [vmem:[#allocation7 + $0x30] sm:$0xff]  ;;  %v510_v4 = vld [vmem:[#allocation8 + $0x28] sm:$0xff]  ;;  %s374_s28 = sshll.u32 %s692_s27, 4  ;;  %s693_s8 = smov 128   ;;  %s375_s28 = int_to_ptr.vmem [resolvable:$true] %s374_s28 }
  0x18   :  { %263 = vmatpush.bf16.msra.mxu1 %v503_v1  ;;  %v501_v5 = vld [vmem:[#allocation7 + $0x28] sm:$0xff]  ;;  %v520_v6 = vld [vmem:[#allocation10 + $0x38] sm:$0xff]  ;;  %v519_v7 = vld [vmem:[#allocation10 + $0x30] sm:$0xff]  ;;  %s694_s9 = smov 8  }
  0x19   :  { %354 = vmatpush.bf16.msra.mxu2 %v520_v6  ;;  %v509_v8 = vld [vmem:[#allocation8 + $0x20] sm:$0xff]  ;;  %v518_v10 = vld [vmem:[#allocation10 + $0x28] sm:$0xff]  ;;  %v508_v11 = vld [vmem:[#allocation8 + $0x18] sm:$0xff] }
  0x1a   :  { %v500_v9 = vld [vmem:[#allocation7 + $0x20] sm:$0xff]  ;;  %v499_v12 = vld [vmem:[#allocation7 + $0x18] sm:$0xff]  ;;  %v507_v14 = vld [vmem:[#allocation8 + $0x10] sm:$0xff] }
  0x1b   :  { %196 = vmatpush.bf16.msra.mxu0 %v511_v2  ;;  %v517_v13 = vld [vmem:[#allocation10 + $0x20] sm:$0xff]  ;;  %v498_v15 = vld [vmem:[#allocation7 + $0x10] sm:$0xff]  ;;  %v506_v16 = vld [vmem:[#allocation8 + $0x8] sm:$0xff] }
  0x1c   :  { %264 = vmatpush.bf16.msra.mxu1 %v502_v3  ;;  %v497_v17 = vld [vmem:[#allocation7 + $0x8] sm:$0xff]  ;;  %v505_v18 = vld [vmem:[#allocation8] sm:$0xff]  ;;  %v504_v20 = vld [vmem:[#allocation5] sm:$0xff] }
  0x1d   :  { %355 = vmatpush.bf16.msra.mxu2 %v519_v7  ;;  %v496_v19 = vld [vmem:[#allocation7] sm:$0xff]  ;;  %v495_v21 = vld [vmem:[#allocation2] sm:$0xff]  ;;  %v516_v22 = vld [vmem:[#allocation10 + $0x18] sm:$0xff] }
  0x1e   :  { %v515_v23 = vld [vmem:[#allocation10 + $0x10] sm:$0xff]  ;;  %v514_v24 = vld [vmem:[#allocation10 + $0x8] sm:$0xff]  ;;  %v513_v25 = vld [vmem:[#allocation10] sm:$0xff] }
  0x1f   :  { %197 = vmatpush.bf16.msra.mxu0 %v510_v4  ;;  %v531_v29 = vld [vmem:[%s763_s4] ss:$0 sm:$0xff] }
  0x20   :  { %265 = vmatpush.bf16.msra.mxu1 %v501_v5  ;;  %v532_v38 = vld [vmem:[%s765_s6] ss:$0 sm:$0xff] }
  0x21   :  { %356 = vmatpush.bf16.msra.mxu2 %v518_v10 }
  0x23   :  { %198 = vmatpush.bf16.msra.mxu0 %v509_v8 }
  0x24   :  { %266 = vmatpush.bf16.msra.mxu1 %v500_v9 }
  0x25   :  { %357 = vmatpush.bf16.msra.mxu2 %v517_v13 }
  0x27   :  { %199 = vmatpush.bf16.msra.mxu0 %v508_v11 }
  0x28   :  { %267 = vmatpush.bf16.msra.mxu1 %v499_v12 }
  0x29   :  { %358 = vmatpush.bf16.msra.mxu2 %v516_v22 }
  0x2b   :  { %200 = vmatpush.bf16.msra.mxu0 %v507_v14 }
  0x2c   :  { %268 = vmatpush.bf16.msra.mxu1 %v498_v15 }
  0x2d   :  { %359 = vmatpush.bf16.msra.mxu2 %v515_v23 }
  0x2f   :  { %201 = vmatpush.bf16.msra.mxu0 %v506_v16 }
  0x30   :  { %269 = vmatpush.bf16.msra.mxu1 %v497_v17 }
  0x31   :  { %360 = vmatpush.bf16.msra.mxu2 %v514_v24 }
  0x33   :  { %202 = vmatpush.bf16.msra.mxu0 %v505_v18 }
  0x34   :  { %270 = vmatpush.bf16.msra.mxu1 %v496_v19 }
  0x35   :  { %361 = vmatpush.bf16.msra.mxu2 %v513_v25 }
  0x36   :  { %203 = vmatmul.bf16.vlgmr.msra.gmra.mxu0 %v504_v20 }
  0x37   :  { %271 = vmatmul.bf16.vlgmr.msra.gmra.mxu1 %v495_v21 }
  0xb3   :  { %v204_v26 = vpop.f32.mrf.mxu0 }
  0xb4   :  { %v272_v27 = vpop.f32.mrf.mxu1 }
  0xb5   :  { %v273_v28 = vadd.f32 %v272_v27, %v204_v26 }
  0xb7   :  { %v281_v32 = vadd.f32 %v531_v29, %v273_v28 }
  0xb9   :  { %v283_v35 = vmax.f32 %v281_v32, 0.0 }
  0xbb   :  { %v206_v30 = vpop.f32.mrf.mxu0 }
  0xbc   :  { %v274_v31 = vpop.f32.mrf.mxu1 }
  0xbd   :  { %v275_v33 = vadd.f32 %v274_v31, %v206_v30 }
  0xbf   :  { %v282_v34 = vadd.f32 %v531_v29, %v275_v33 }
  0xc1   :  { %v284_v36 = vmax.f32 %v282_v34, 0.0 }
  0xc3   :  { %v285_v37 = vpack.c.bf16 %v284_v36, %v283_v35 }
  0xc5   :  { %362 = vmatmul.bf16.vlgmr.msra.gmra.mxu2 %v285_v37 }
 0x148   :  { %v363_v39 = vpop.f32.mrf.mxu2 }
 0x149   :  { %v364_v40 = vadd.f32 %v532_v38, %v363_v39 }
 0x14b   :  { %368 = vst [vmem:[#allocation11] sm:$0xff] %v364_v40 }
 0x150   :  { %v365_v41 = vpop.f32.mrf.mxu2 }
 0x151   :  { %v366_v42 = vadd.f32 %v532_v38, %v365_v41 }
 0x153   :  { %369 = vst [vmem:[#allocation11 + $0x8] sm:$0xff] %v366_v42 }
 0x154   :  { %382 = dma.vmem_to_hbm [thread:$0]  %s375_s28, 256, %s377_s30, [#allocation4], %s693_s8, %s693_s8, %s694_s9  }
 0x155   :  { %683 = dma.done.wait [#allocation4], 256  }
 0x156   :  { %684 = vsyncadd [#allocation4], 4294967040 }
 0x157   :  { %387 = vsyncpa [#allocation3], 1 }
 0x158   :  { %388 = vsyncpa [#allocation6], 1 }
 0x159   :  { %389 = vsyncpa [#allocation9], 1 }
 0x15a   :  { %390 = vsyncpa [#allocation4], 1 }

</bundles_post_ra>
